<compile_context>
chip_gen: v5e
topology: v5e:2x2
jax: 0.10.0
libtpu: 0.0.40
codegen_flags: <defaults>
</compile_context>

<pallas_src>
import numpy as np
import jax
import jax.numpy as jnp
from jax import lax
from jax.experimental import pallas as pl
from jax.experimental.pallas import tpu as pltpu

H_IN, W_IN = 14, 14
N_ACTIONS = 4
LANE = 128


def _round_up(a, m):
    return (a + m - 1) // m * m


# ---------------------------------------------------------------------------
# Host-side parameter preprocessing (run ONCE per weight update)
# ---------------------------------------------------------------------------
def _conv_as_dense(w, b, h, w_in):
    """Dense matrix of a VALID KxK conv acting on CHW-flattened feature rows."""
    cout, cin, kh, kw = w.shape
    ho, wo = h - kh + 1, w_in - kw + 1
    m = np.zeros((cin * h * w_in, cout * ho * wo), np.float32)
    bfull = np.zeros((cout * ho * wo,), np.float32)
    for co in range(cout):
        for ci in range(cin):
            for i in range(ho):
                for j in range(wo):
                    o = co * ho * wo + i * wo + j
                    for dh in range(kh):
                        for dw in range(kw):
                            m[ci * h * w_in + (i + dh) * w_in + (j + dw), o] = \
                                w[co, ci, dh, dw]
    for co in range(cout):
        bfull[co * ho * wo:(co + 1) * ho * wo] = b[co]
    return m, bfull


def _pool_selectors(c, h, w):
    """Four 0/1 gather matrices; elementwise max of the 4 products == 2x2/2 maxpool."""
    ho, wo = h // 2, w // 2
    s = np.zeros((4, c * h * w, c * ho * wo), np.float32)
    for ch in range(c):
        for p in range(ho):
            for q in range(wo):
                g = ch * ho * wo + p * wo + q
                k = 0
                for di in range(2):
                    for dj in range(2):
                        s[k, ch * h * w + (2 * p + di) * w + (2 * q + dj), g] = 1.0
                        k += 1
    return s


def _fold_pool_into_conv(conv_m, conv_b, sel, in_pad):
    """Fold the 4 pool selectors into the conv Toeplitz matrix.

    Output: (in_pad, 4*128) where slice k (128 lanes, real width = sel.shape[2],
    rest zero) is conv_m @ sel[k]; bias folded the same way.  Valid because each
    selector column has exactly one 1 (gather), so ReLU/bias commute with it and
    max commutes with ReLU.
    """
    n_in, real_out = conv_m.shape[0], sel.shape[2]
    w = np.zeros((in_pad, 4 * LANE), np.float32)
    bias = np.zeros((4 * LANE,), np.float32)
    for k in range(4):
        w[:n_in, k * LANE:k * LANE + real_out] = conv_m @ sel[k]
        bias[k * LANE:k * LANE + real_out] = conv_b @ sel[k]
    return w, bias


def preprocess_params(params):
    """Build padded/folded bf16 weights + packed f32 bias buffer (device arrays)."""
    wnp = {k: np.asarray(v, np.float32) for k, v in params.items()}

    h1, w1d = H_IN - 2, W_IN - 2          # after conv1: 12x12, C=3
    h1p, w1p = h1 // 2, w1d // 2          # after pool1: 6x6
    h2, w2d = h1p - 2, w1p - 2            # after conv2: 4x4, C=6

    c1, cb1 = _conv_as_dense(wnp["conv1_w"], wnp["conv1_b"], H_IN, W_IN)  # (196,432)
    s1 = _pool_selectors(3, h1, w1d)                                      # (4,432,108)
    c2, cb2 = _conv_as_dense(wnp["conv2_w"], wnp["conv2_b"], h1p, w1p)    # (108,96)
    s2 = _pool_selectors(6, h2, w2d)                                      # (4,96,24)

    w1, b1 = _fold_pool_into_conv(c1, cb1, s1, in_pad=H_IN * W_IN)  # (196,512)
    w2, b2 = _fold_pool_into_conv(c2, cb2, s2, in_pad=LANE)         # (128,512)

    # fc layers, lane/sublane padded to multiples of 128 with zeros.
    w3 = np.zeros((LANE, LANE), np.float32)        # fc1: 24->50
    w3[:24, :50] = wnp["fc1_w"].T
    b3 = np.zeros((LANE,), np.float32); b3[:50] = wnp["fc1_b"]
    w4 = np.zeros((LANE, 2 * LANE), np.float32)    # fc2: 50->200
    w4[:50, :200] = wnp["fc2_w"].T
    b4 = np.zeros((2 * LANE,), np.float32); b4[:200] = wnp["fc2_b"]
    w5 = np.zeros((2 * LANE, LANE), np.float32)    # fc3: 200->4 (lane-padded out)
    w5[:200, :N_ACTIONS] = wnp["fc3_w"].T
    b5 = np.zeros((LANE,), np.float32); b5[:N_ACTIONS] = wnp["fc3_b"]

    # Pack all five bias rows into one (8, 512) f32 buffer (single small DMA).
    biases = np.zeros((8, 4 * LANE), np.float32)
    biases[0, :] = b1
    biases[1, :] = b2
    biases[2, :LANE] = b3
    biases[3, :2 * LANE] = b4
    biases[4, :LANE] = b5

    bf16 = jnp.bfloat16
    return {
        "w1": jnp.asarray(w1, bf16),
        "w2": jnp.asarray(w2, bf16),
        "w3": jnp.asarray(w3, bf16),
        "w4": jnp.asarray(w4, bf16),
        "w5": jnp.asarray(w5, bf16),
        "biases": jnp.asarray(biases, jnp.float32),
    }


# ---------------------------------------------------------------------------
# Pallas kernel: whole forward pass for one batch tile
# ---------------------------------------------------------------------------
def _dqn_kernel(x_ref, w1_ref, w2_ref, w3_ref, w4_ref, w5_ref, b_ref, out_ref):
    f32 = jnp.float32

    def pool4(y):
        # y: (TB, 512); maxpool == max over the four lane-aligned 128-wide slices
        return jnp.maximum(
            jnp.maximum(y[:, 0 * LANE:1 * LANE], y[:, 1 * LANE:2 * LANE]),
            jnp.maximum(y[:, 2 * LANE:3 * LANE], y[:, 3 * LANE:4 * LANE]))

    # In-kernel cast to bf16 (cheap VPU pack) -- x is streamed in native dtype.
    x = x_ref[...].astype(jnp.bfloat16)                               # (TB,196)

    # conv1 + bias + ReLU + 2x2/2 maxpool, all folded into one MXU matmul.
    y = jnp.dot(x, w1_ref[...], preferred_element_type=f32)          # (TB,512) f32
    p1 = pool4(jnp.maximum(y + b_ref[0:1, :], 0.0))                  # (TB,128)

    # conv2 + bias + ReLU + maxpool, folded likewise.
    y = jnp.dot(p1.astype(w2_ref.dtype), w2_ref[...],
                preferred_element_type=f32)                           # (TB,512)
    p2 = pool4(jnp.maximum(y + b_ref[1:2, :], 0.0))                  # (TB,128)

    # fc1 -> relu -> fc2 -> relu -> fc3 (lane-padded; elementwise stays f32).
    h = jnp.dot(p2.astype(w3_ref.dtype), w3_ref[...], preferred_element_type=f32)
    h = jnp.maximum(h + b_ref[2:3, 0:LANE], 0.0)                     # (TB,128)
    h = jnp.dot(h.astype(w4_ref.dtype), w4_ref[...], preferred_element_type=f32)
    h = jnp.maximum(h + b_ref[3:4, 0:2 * LANE], 0.0)                 # (TB,256)
    o = jnp.dot(h.astype(w5_ref.dtype), w5_ref[...], preferred_element_type=f32)
    # bf16 output store: halves the (TB,128) HBM writeback.
    out_ref[...] = (o + b_ref[4:5, 0:LANE]).astype(out_ref.dtype)    # (TB,128)


# ---------------------------------------------------------------------------
# Wrapper: batch-tiled pallas_call
# ---------------------------------------------------------------------------
def _choose_tb(b, tb_req):
    """Batch tile: multiple of 16 (bf16 sublane packing), large enough to
    amortize the ~0.35us per-grid-step overhead, but split so the grid has
    >= 2 steps when the batch allows it (v7x: 2 TensorCores)."""
    tb = _round_up(max(16, min(tb_req, _round_up(b, 16))), 16)
    if b > 16 and _round_up(b, tb) // tb < 2:
        tb = _round_up(-(-b // 2), 16)          # split into (at least) two tiles
    return tb


def dq_forward_pallas(x_nchw, packed, *, tb=1024):
    if tuple(x_nchw.shape[1:]) != (1, H_IN, W_IN):
        raise ValueError(
            f"DQModelWithCNN forward requires NCHW input (B, 1, {H_IN}, {W_IN}); "
            f"got {x_nchw.shape} (the module's 21x31 default is inconsistent "
            f"with fc1=Linear(24, 50)).")
    b = x_nchw.shape[0]
    feat = H_IN * W_IN
    x_flat = x_nchw.reshape(b, feat)             # native dtype; cast happens in-kernel

    # tb is capped at 2048 so the f32 (tb,512) intermediates + double-buffered
    # tiles stay far below v7x's 64 MiB physical VMEM.
    tb = _choose_tb(b, min(tb, 2048))
    b_pad = _round_up(b, tb)
    if b_pad != b:                               # pad only when a tail tile exists
        x_flat = jnp.pad(x_flat, ((0, b_pad - b), (0, 0)))
    grid = (b_pad // tb,)

    wkeys = ("w1", "w2", "w3", "w4", "w5", "biases")
    weight_bytes = sum(int(np.prod(packed[k].shape)) * packed[k].dtype.itemsize
                       for k in wkeys)
    mm_flops = sum(2 * packed[k].shape[0] * packed[k].shape[1]
                   for k in ("w1", "w2", "w3", "w4", "w5"))
    cost = pl.CostEstimate(
        flops=b_pad * mm_flops,
        transcendentals=0,
        bytes_accessed=(b_pad * feat * x_flat.dtype.itemsize
                        + b_pad * LANE * 2        # bf16 output
                        + weight_bytes),
    )

    out = pl.pallas_call(
        _dqn_kernel,
        out_shape=jax.ShapeDtypeStruct((b_pad, LANE), jnp.bfloat16),
        grid=grid,
        in_specs=[pl.BlockSpec((tb, feat), lambda i: (i, 0))] + [
            # Constant index_map -> weights DMA'd once and stay VMEM-resident.
            pl.BlockSpec(tuple(packed[k].shape), lambda i: (0, 0)) for k in wkeys
        ],
        out_specs=pl.BlockSpec((tb, LANE), lambda i: (i, 0)),
        compiler_params=pltpu.CompilerParams(
            dimension_semantics=("parallel",),
            vmem_limit_bytes=48 * 1024 * 1024,   # headroom under v7x's 64 MiB
        ),
        cost_estimate=cost,
    )(x_flat, *[packed[k] for k in wkeys])

    # Only 4 of 128 lanes are real; tiny slice cast back to f32 host-side.
    return out[:b, :N_ACTIONS].astype(jnp.float32)


# ---------------------------------------------------------------------------
# Deterministic parameter init (shapes from DQModelWithCNN.__init__)
# ---------------------------------------------------------------------------
def init_params(key):
    ks = jax.random.split(key, 10)
    s = 0.1
    return {
        "conv1_w": jax.random.normal(ks[0], (3, 1, 3, 3), jnp.float32) * s,
        "conv1_b": jax.random.normal(ks[1], (3,), jnp.float32) * s,
        "conv2_w": jax.random.normal(ks[2], (6, 3, 3, 3), jnp.float32) * s,
        "conv2_b": jax.random.normal(ks[3], (6,), jnp.float32) * s,
        "fc1_w": jax.random.normal(ks[4], (50, 24), jnp.float32) * s,
        "fc1_b": jax.random.normal(ks[5], (50,), jnp.float32) * s,
        "fc2_w": jax.random.normal(ks[6], (200, 50), jnp.float32) * s,
        "fc2_b": jax.random.normal(ks[7], (200,), jnp.float32) * s,
        "fc3_w": jax.random.normal(ks[8], (N_ACTIONS, 200), jnp.float32) * s,
        "fc3_b": jax.random.normal(ks[9], (N_ACTIONS,), jnp.float32) * s,
    }


# Pure-JAX reference (mirrors the PyTorch forward exactly, f32) for verification.
def dq_forward_reference(x_nchw, p):
    dn = ("NCHW", "OIHW", "NCHW")
    y = lax.conv_general_dilated(x_nchw, p["conv1_w"], (1, 1), "VALID",
                                 dimension_numbers=dn)
    y = jnp.maximum(y + p["conv1_b"][None, :, None, None], 0.0)
    y = lax.reduce_window(y, -jnp.inf, lax.max, (1, 1, 2, 2), (1, 1, 2, 2), "VALID")
    y = lax.conv_general_dilated(y, p["conv2_w"], (1, 1), "VALID",
                                 dimension_numbers=dn)
    y = jnp.maximum(y + p["conv2_b"][None, :, None, None], 0.0)
    y = lax.reduce_window(y, -jnp.inf, lax.max, (1, 1, 2, 2), (1, 1, 2, 2), "VALID")
    f = y.reshape(y.shape[0], -1)                       # torch.flatten(x, 1)
    h = jnp.maximum(f @ p["fc1_w"].T + p["fc1_b"], 0.0)
    h = jnp.maximum(h @ p["fc2_w"].T + p["fc2_b"], 0.0)
    return h @ p["fc3_w"].T + p["fc3_b"]


if __name__ == "__main__":
    key = jax.random.PRNGKey(0)
    pkey, xkey, xkey2 = jax.random.split(key, 3)
    params = init_params(pkey)
    packed = preprocess_params(params)   # hoisted: once per weight update

    # PyTorch conv input is NCHW: (batch=2, channels=1, H=14, W=14).
    x = jax.random.normal(xkey, (2, 1, H_IN, W_IN), jnp.float32)
    out = jax.block_until_ready(dq_forward_pallas(x, packed))
    ref = dq_forward_reference(x, params)
    # bf16 matmul inputs / bf16 output (f32 accumulation) -> ~1e-3..1e-2 deviation.
    np.testing.assert_allclose(np.asarray(out), np.asarray(ref),
                               rtol=5e-2, atol=5e-2)

    # Exercise batch tiling: grid > 1 plus a padded tail tile (B=40, TB=16).
    x2 = jax.random.normal(xkey2, (40, 1, H_IN, W_IN), jnp.float32)
    out2 = jax.block_until_ready(dq_forward_pallas(x2, packed, tb=16))
    ref2 = dq_forward_reference(x2, params)
    np.testing.assert_allclose(np.asarray(out2), np.asarray(ref2),
                               rtol=5e-2, atol=5e-2)

    # Exercise the grid>=2 splitter (single-tile batch gets split for megacore).
    x3 = jax.random.normal(xkey2, (96, 1, H_IN, W_IN), jnp.float32)
    out3 = jax.block_until_ready(dq_forward_pallas(x3, packed))
    ref3 = dq_forward_reference(x3, params)
    np.testing.assert_allclose(np.asarray(out3), np.asarray(ref3),
                               rtol=5e-2, atol=5e-2)

    print("KERNEL_OK")
</pallas_src>

<mosaic_0001>
module attributes {stable_mosaic.version = 11 : i64} {
  func.func @_dqn_kernel(%arg0: i32, %arg1: memref<16x196xf32, #tpu.memory_space<vmem>>, %arg2: memref<196x512xbf16, #tpu.memory_space<vmem>>, %arg3: memref<128x512xbf16, #tpu.memory_space<vmem>>, %arg4: memref<128x128xbf16, #tpu.memory_space<vmem>>, %arg5: memref<128x256xbf16, #tpu.memory_space<vmem>>, %arg6: memref<256x128xbf16, #tpu.memory_space<vmem>>, %arg7: memref<8x512xf32, #tpu.memory_space<vmem>>, %arg8: memref<16x128xbf16, #tpu.memory_space<vmem>>) attributes {dimension_semantics = [#tpu.dimension_semantics<parallel>], iteration_bounds = array<i64: 1>, scalar_prefetch = 0 : i64, scratch_operands = 0 : i64, tpu.core_type = #tpu.core_type<tc>, window_params = [{transform_indices = @transform_0, window_bounds = array<i64: 16, 196>}, {pipeline_mode = #tpu.pipeline_mode<synchronous>, transform_indices = @transform_1, window_bounds = array<i64: 196, 512>}, {pipeline_mode = #tpu.pipeline_mode<synchronous>, transform_indices = @transform_2, window_bounds = array<i64: 128, 512>}, {pipeline_mode = #tpu.pipeline_mode<synchronous>, transform_indices = @transform_3, window_bounds = array<i64: 128, 128>}, {pipeline_mode = #tpu.pipeline_mode<synchronous>, transform_indices = @transform_4, window_bounds = array<i64: 128, 256>}, {pipeline_mode = #tpu.pipeline_mode<synchronous>, transform_indices = @transform_5, window_bounds = array<i64: 256, 128>}, {pipeline_mode = #tpu.pipeline_mode<synchronous>, transform_indices = @transform_6, window_bounds = array<i64: 8, 512>}, {transform_indices = @transform_7, window_bounds = array<i64: 16, 128>}]} {
    %c0 = arith.constant 0 : index
    %c0_0 = arith.constant 0 : index
    %0 = vector.load %arg1[%c0, %c0_0] : memref<16x196xf32, #tpu.memory_space<vmem>>, vector<16x196xf32>
    %1 = arith.truncf %0 : vector<16x196xf32> to vector<16x196xbf16>
    %c0_1 = arith.constant 0 : index
    %c0_2 = arith.constant 0 : index
    %2 = vector.load %arg2[%c0_1, %c0_2] : memref<196x512xbf16, #tpu.memory_space<vmem>>, vector<196x512xbf16>
    %cst = arith.constant dense<0.000000e+00> : vector<16x512xf32>
    %3 = tpu.matmul %1, %2, %cst {dimension_numbers = #tpu.dot_dimension_numbers<[1], [0], [0], [1], [0, 0, 1, 1], [], []>} : vector<16x196xbf16>, vector<196x512xbf16>, vector<16x512xf32> -> vector<16x512xf32>
    %c0_3 = arith.constant 0 : index
    %c0_4 = arith.constant 0 : index
    %4 = vector.load %arg7[%c0_3, %c0_4] : memref<8x512xf32, #tpu.memory_space<vmem>>, vector<1x512xf32>
    %5 = vector.broadcast %4 : vector<1x512xf32> to vector<16x512xf32>
    %6 = arith.addf %3, %5 : vector<16x512xf32>
    %cst_5 = arith.constant 0.000000e+00 : f32
    %7 = vector.broadcast %cst_5 : f32 to vector<16x512xf32>
    %8 = arith.maximumf %6, %7 : vector<16x512xf32>
    %9 = vector.extract_strided_slice %8 {offsets = [0, 0], sizes = [16, 128], strides = [1, 1]} : vector<16x512xf32> to vector<16x128xf32>
    %10 = vector.extract_strided_slice %8 {offsets = [0, 128], sizes = [16, 128], strides = [1, 1]} : vector<16x512xf32> to vector<16x128xf32>
    %11 = arith.maximumf %9, %10 : vector<16x128xf32>
    %12 = vector.extract_strided_slice %8 {offsets = [0, 256], sizes = [16, 128], strides = [1, 1]} : vector<16x512xf32> to vector<16x128xf32>
    %13 = vector.extract_strided_slice %8 {offsets = [0, 384], sizes = [16, 128], strides = [1, 1]} : vector<16x512xf32> to vector<16x128xf32>
    %14 = arith.maximumf %12, %13 : vector<16x128xf32>
    %15 = arith.maximumf %11, %14 : vector<16x128xf32>
    %16 = arith.truncf %15 : vector<16x128xf32> to vector<16x128xbf16>
    %c0_6 = arith.constant 0 : index
    %c0_7 = arith.constant 0 : index
    %17 = vector.load %arg3[%c0_6, %c0_7] : memref<128x512xbf16, #tpu.memory_space<vmem>>, vector<128x512xbf16>
    %cst_8 = arith.constant dense<0.000000e+00> : vector<16x512xf32>
    %18 = tpu.matmul %16, %17, %cst_8 {dimension_numbers = #tpu.dot_dimension_numbers<[1], [0], [0], [1], [0, 0, 1, 1], [], []>} : vector<16x128xbf16>, vector<128x512xbf16>, vector<16x512xf32> -> vector<16x512xf32>
    %c1 = arith.constant 1 : index
    %c0_9 = arith.constant 0 : index
    %19 = vector.load %arg7[%c1, %c0_9] : memref<8x512xf32, #tpu.memory_space<vmem>>, vector<1x512xf32>
    %20 = vector.broadcast %19 : vector<1x512xf32> to vector<16x512xf32>
    %21 = arith.addf %18, %20 : vector<16x512xf32>
    %cst_10 = arith.constant 0.000000e+00 : f32
    %22 = vector.broadcast %cst_10 : f32 to vector<16x512xf32>
    %23 = arith.maximumf %21, %22 : vector<16x512xf32>
    %24 = vector.extract_strided_slice %23 {offsets = [0, 0], sizes = [16, 128], strides = [1, 1]} : vector<16x512xf32> to vector<16x128xf32>
    %25 = vector.extract_strided_slice %23 {offsets = [0, 128], sizes = [16, 128], strides = [1, 1]} : vector<16x512xf32> to vector<16x128xf32>
    %26 = arith.maximumf %24, %25 : vector<16x128xf32>
    %27 = vector.extract_strided_slice %23 {offsets = [0, 256], sizes = [16, 128], strides = [1, 1]} : vector<16x512xf32> to vector<16x128xf32>
    %28 = vector.extract_strided_slice %23 {offsets = [0, 384], sizes = [16, 128], strides = [1, 1]} : vector<16x512xf32> to vector<16x128xf32>
    %29 = arith.maximumf %27, %28 : vector<16x128xf32>
    %30 = arith.maximumf %26, %29 : vector<16x128xf32>
    %31 = arith.truncf %30 : vector<16x128xf32> to vector<16x128xbf16>
    %c0_11 = arith.constant 0 : index
    %c0_12 = arith.constant 0 : index
    %32 = vector.load %arg4[%c0_11, %c0_12] : memref<128x128xbf16, #tpu.memory_space<vmem>>, vector<128x128xbf16>
    %cst_13 = arith.constant dense<0.000000e+00> : vector<16x128xf32>
    %33 = tpu.matmul %31, %32, %cst_13 {dimension_numbers = #tpu.dot_dimension_numbers<[1], [0], [0], [1], [0, 0, 1, 1], [], []>} : vector<16x128xbf16>, vector<128x128xbf16>, vector<16x128xf32> -> vector<16x128xf32>
    %c2 = arith.constant 2 : index
    %c0_14 = arith.constant 0 : index
    %34 = vector.load %arg7[%c2, %c0_14] : memref<8x512xf32, #tpu.memory_space<vmem>>, vector<1x128xf32>
    %35 = vector.broadcast %34 : vector<1x128xf32> to vector<16x128xf32>
    %36 = arith.addf %33, %35 : vector<16x128xf32>
    %cst_15 = arith.constant 0.000000e+00 : f32
    %37 = vector.broadcast %cst_15 : f32 to vector<16x128xf32>
    %38 = arith.maximumf %36, %37 : vector<16x128xf32>
    %39 = arith.truncf %38 : vector<16x128xf32> to vector<16x128xbf16>
    %c0_16 = arith.constant 0 : index
    %c0_17 = arith.constant 0 : index
    %40 = vector.load %arg5[%c0_16, %c0_17] : memref<128x256xbf16, #tpu.memory_space<vmem>>, vector<128x256xbf16>
    %cst_18 = arith.constant dense<0.000000e+00> : vector<16x256xf32>
    %41 = tpu.matmul %39, %40, %cst_18 {dimension_numbers = #tpu.dot_dimension_numbers<[1], [0], [0], [1], [0, 0, 1, 1], [], []>} : vector<16x128xbf16>, vector<128x256xbf16>, vector<16x256xf32> -> vector<16x256xf32>
    %c3 = arith.constant 3 : index
    %c0_19 = arith.constant 0 : index
    %42 = vector.load %arg7[%c3, %c0_19] : memref<8x512xf32, #tpu.memory_space<vmem>>, vector<1x256xf32>
    %43 = vector.broadcast %42 : vector<1x256xf32> to vector<16x256xf32>
    %44 = arith.addf %41, %43 : vector<16x256xf32>
    %cst_20 = arith.constant 0.000000e+00 : f32
    %45 = vector.broadcast %cst_20 : f32 to vector<16x256xf32>
    %46 = arith.maximumf %44, %45 : vector<16x256xf32>
    %47 = arith.truncf %46 : vector<16x256xf32> to vector<16x256xbf16>
    %c0_21 = arith.constant 0 : index
    %c0_22 = arith.constant 0 : index
    %48 = vector.load %arg6[%c0_21, %c0_22] : memref<256x128xbf16, #tpu.memory_space<vmem>>, vector<256x128xbf16>
    %cst_23 = arith.constant dense<0.000000e+00> : vector<16x128xf32>
    %49 = tpu.matmul %47, %48, %cst_23 {dimension_numbers = #tpu.dot_dimension_numbers<[1], [0], [0], [1], [0, 0, 1, 1], [], []>} : vector<16x256xbf16>, vector<256x128xbf16>, vector<16x128xf32> -> vector<16x128xf32>
    %c4 = arith.constant 4 : index
    %c0_24 = arith.constant 0 : index
    %50 = vector.load %arg7[%c4, %c0_24] : memref<8x512xf32, #tpu.memory_space<vmem>>, vector<1x128xf32>
    %51 = vector.broadcast %50 : vector<1x128xf32> to vector<16x128xf32>
    %52 = arith.addf %49, %51 : vector<16x128xf32>
    %53 = arith.truncf %52 : vector<16x128xf32> to vector<16x128xbf16>
    %c0_25 = arith.constant 0 : index
    %c0_26 = arith.constant 0 : index
    %54 = vector.load %arg8[%c0_25, %c0_26] : memref<16x128xbf16, #tpu.memory_space<vmem>>, vector<16x128xbf16>
    tpu.vector_store %arg8[%c0_25, %c0_26], %53 {strides = array<i32>} : memref<16x128xbf16, #tpu.memory_space<vmem>>, vector<16x128xbf16>,
    return
  }
  func.func @transform_0(%arg0: i32) -> (i32, i32) {
    %c0_i32 = arith.constant 0 : i32
    %c0_i32_0 = arith.constant 0 : i32
    return %arg0, %c0_i32 : i32, i32
  }
  func.func @transform_1(%arg0: i32) -> (i32, i32) {
    %c0_i32 = arith.constant 0 : i32
    %c0_i32_0 = arith.constant 0 : i32
    %c0_i32_1 = arith.constant 0 : i32
    return %c0_i32, %c0_i32_0 : i32, i32
  }
  func.func @transform_2(%arg0: i32) -> (i32, i32) {
    %c0_i32 = arith.constant 0 : i32
    %c0_i32_0 = arith.constant 0 : i32
    %c0_i32_1 = arith.constant 0 : i32
    return %c0_i32, %c0_i32_0 : i32, i32
  }
  func.func @transform_3(%arg0: i32) -> (i32, i32) {
    %c0_i32 = arith.constant 0 : i32
    %c0_i32_0 = arith.constant 0 : i32
    %c0_i32_1 = arith.constant 0 : i32
    return %c0_i32, %c0_i32_0 : i32, i32
  }
  func.func @transform_4(%arg0: i32) -> (i32, i32) {
    %c0_i32 = arith.constant 0 : i32
    %c0_i32_0 = arith.constant 0 : i32
    %c0_i32_1 = arith.constant 0 : i32
    return %c0_i32, %c0_i32_0 : i32, i32
  }
  func.func @transform_5(%arg0: i32) -> (i32, i32) {
    %c0_i32 = arith.constant 0 : i32
    %c0_i32_0 = arith.constant 0 : i32
    %c0_i32_1 = arith.constant 0 : i32
    return %c0_i32, %c0_i32_0 : i32, i32
  }
  func.func @transform_6(%arg0: i32) -> (i32, i32) {
    %c0_i32 = arith.constant 0 : i32
    %c0_i32_0 = arith.constant 0 : i32
    %c0_i32_1 = arith.constant 0 : i32
    return %c0_i32, %c0_i32_0 : i32, i32
  }
  func.func @transform_7(%arg0: i32) -> (i32, i32) {
    %c0_i32 = arith.constant 0 : i32
    %c0_i32_0 = arith.constant 0 : i32
    return %arg0, %c0_i32 : i32, i32
  }
}

</mosaic_0001>

<bundles_post_ra>
// kernel: tpu_custom_call.1
= control target key start
LH: loop header
LB: loop body
LE: loop exit
PB: predicated region body
PF: predicated region fallthrough
CT: control target
= control target key end

     0   :  { %12 = vsyncpa [#allocation3], 0  ;;  %s2218_s0 = inlined_call_operand.hbm [shape: f32[16,196], index: 0, kind: input, shape index: {}]   ;;  %s2219_s1 = inlined_call_operand.hbm [shape: bf16[196,512], index: 1, kind: input, shape index: {}]   ;;  %s2220_s2 = inlined_call_operand.hbm [shape: bf16[128,512], index: 2, kind: input, shape index: {}]   ;;  %s2221_s3 = inlined_call_operand.hbm [shape: bf16[128,128], index: 3, kind: input, shape index: {}]   ;;  %s2222_s4 = inlined_call_operand.hbm [shape: bf16[128,256], index: 4, kind: input, shape index: {}]   ;;  %s2223_s5 = inlined_call_operand.hbm [shape: bf16[256,128], index: 5, kind: input, shape index: {}]   ;;  %s2224_s6 = inlined_call_operand.hbm [shape: f32[8,512], index: 6, kind: input, shape index: {}]   ;;  %s2225_s7 = inlined_call_operand.hbm [shape: bf16[16,128], index: 7, kind: output, shape index: {}]  }
   0x1   :  { %13 = vsyncpa [#allocation6], 0 }
   0x2   :  { %14 = vsyncpa [#allocation9], 0 }
   0x3   :  { %15 = vsyncpa [#allocation12], 0 }
   0x4   :  { %16 = vsyncpa [#allocation4], 0  ;;  %s34_s26 = sshll.u32 %s2219_s1, 4  ;;  %s2096_s27 = smov [#allocation5]   ;;  %s35_s26 = int_to_ptr.hbm [resolvable:$true] %s34_s26 }
   0x5   :  { %s36_s28 = sshll.u32 %s2096_s27, 4  ;;  %s60_s8 = sshll.u32 %s2221_s3, 4  ;;  %s37_s28 = int_to_ptr.vmem [resolvable:$true] %s36_s28  ;;  %s61_s8 = int_to_ptr.hbm [resolvable:$true] %s60_s8 }
   0x6   :  { %s2097_s9 = smov 256   ;;  %s2098_s10 = smov 16  }
   0x7   :  { %42 = dma.hbm_to_vmem [thread:$0]  %s35_s26, 6400, %s37_s28, [#allocation6], %s2097_s9, %s2097_s9, %s2098_s10  }
   0x8   :  { %s2099_s11 = smov [#allocation8]   ;;  %s2100_s13 = smov 64  }
   0x9   :  { %s62_s12 = sshll.u32 %s2099_s11, 4  ;;  %s2101_s1 = smov 4   ;;  %s63_s12 = int_to_ptr.vmem [resolvable:$true] %s62_s12 }
   0xa   :  { %68 = dma.hbm_to_vmem [thread:$0]  %s61_s8, 1024, %s63_s12, [#allocation9], %s2100_s13, %s2100_s13, %s2101_s1  }
   0xb   :  { %s86_s3 = sshll.u32 %s2223_s5, 4  ;;  %s2102_s16 = smov [#allocation11]   ;;  %s87_s3 = int_to_ptr.hbm [resolvable:$true] %s86_s3 }
   0xc   :  { %s88_s17 = sshll.u32 %s2102_s16, 4  ;;  %s21_s20 = sshll.u32 %s2218_s0, 4  ;;  %s89_s17 = int_to_ptr.vmem [resolvable:$true] %s88_s17  ;;  %s22_s20 = int_to_ptr.hbm [resolvable:$true] %s21_s20 }
   0xd   :  { %94 = dma.hbm_to_vmem [thread:$0]  %s87_s3, 2048, %s89_s17, [#allocation12], %s2100_s13, %s2100_s13, %s2101_s1  }
   0xe   :  { %s2103_s21 = smov [#allocation2]   ;;  %s47_s25 = sshll.u32 %s2220_s2, 4  ;;  %s48_s25 = int_to_ptr.hbm [resolvable:$true] %s47_s25 }
   0xf   :  { %s23_s22 = sshll.u32 %s2103_s21, 4  ;;  %s73_s0 = sshll.u32 %s2222_s4, 4  ;;  %s24_s22 = int_to_ptr.vmem [resolvable:$true] %s23_s22  ;;  %s74_s0 = int_to_ptr.hbm [resolvable:$true] %s73_s0 }
  0x10   :  { %29 = dma.hbm_to_vmem [thread:$0]  %s22_s20, 512, %s24_s22, [#allocation3], %s2097_s9, %s2097_s9, %s2098_s10  }
  0x11   :  { %s2104_s27 = smov [#allocation7]   ;;  %s2105_s29 = smov [#allocation10]  }
  0x12   :  { %s49_s28 = sshll.u32 %s2104_s27, 4  ;;  %s75_s2 = sshll.u32 %s2105_s29, 4  ;;  %s50_s28 = int_to_ptr.vmem [resolvable:$true] %s49_s28  ;;  %s76_s2 = int_to_ptr.vmem [resolvable:$true] %s75_s2 }
  0x13   :  { %55 = dma.hbm_to_vmem [thread:$0]  %s48_s25, 4096, %s50_s28, [#allocation6], %s2097_s9, %s2097_s9, %s2098_s10  }
  0x14   :  { %s2106_s30 = smov 128   ;;  %s2107_s8 = smov 8  }
  0x15   :  { %81 = dma.hbm_to_vmem [thread:$0]  %s74_s0, 2048, %s76_s2, [#allocation9], %s2106_s30, %s2106_s30, %s2107_s8  }
  0x16   :  { %s100_s14 = sshll.u32 %s2224_s6, 4  ;;  %s2108_s4 = smov [#allocation13]   ;;  %s101_s14 = int_to_ptr.hbm [resolvable:$true] %s100_s14 }
  0x17   :  { %s102_s15 = sshll.u32 %s2108_s4, 4  ;;  %s103_s15 = int_to_ptr.vmem [resolvable:$true] %s102_s15 }
  0x18   :  { %105 = dma.hbm_to_vmem [thread:$0]  %s101_s14, 512, %s103_s15, [#allocation12]  }
  0x19   :  { %2086 = dma.done.wait [#allocation3], 512  }
  0x1a   :  { %2087 = vsyncadd [#allocation3], 4294966784 }
  0x1b   :  { %2088 = dma.done.wait [#allocation6], 10496  }
  0x1c   :  { %2089 = vsyncadd [#allocation6], 4294956800 }
  0x1d   :  { %2090 = dma.done.wait [#allocation9], 3072  }
  0x1e   :  { %2091 = vsyncadd [#allocation9], 4294964224 }
  0x1f   :  { %2092 = dma.done.wait [#allocation12], 2560  }
  0x20   :  { %2093 = vsyncadd [#allocation12], 4294964736  ;;  %v1385_v0 = vld [vmem:[#allocation5 + $0xe0] sm:$0xf]  ;;  %v1785_v1 = vld [vmem:[#allocation5 + $0xec] sm:$0xf0] }
  0x21   :  { %v1783_v2 = vld [vmem:[#allocation5 + $0xe4] sm:$0xf]  ;;  %v1386_v3 = vor.u32 %v1785_v1, %v1385_v0  ;;  %v1387_v4 = vld [vmem:[#allocation5 + $0xf0] sm:$0xf0]  ;;  %v1369_v5 = vld [vmem:[#allocation5 + $0xc0] sm:$0xf] }
  0x22   :  { %v1781_v6 = vld [vmem:[#allocation5 + $0xcc] sm:$0xf0]  ;;  %v1390_v7 = vor.u32 %v1783_v2, %v1387_v4  ;;  %v189_v8 = vld [vmem:[#allocation5 + $0x180] sm:$0x33]  ;;  %v1371_v10 = vld [vmem:[#allocation5 + $0xd0] sm:$0xf0] }
  0x23   :  { %v1779_v9 = vld [vmem:[#allocation5 + $0xc4] sm:$0xf]  ;;  %468 = vmatpush.bf16.msra.mxu0 %v1386_v3  ;;  %v1370_v11 = vor.u32 %v1781_v6, %v1369_v5  ;;  %v347_v12 = vunpack.c.l.b16 %v189_v8  ;;  %vm455_vm0 = vcmask 1041408   ;;  %v348_v13 = vunpack.c.h.b16 %v189_v8  ;;  %v1353_v15 = vld [vmem:[#allocation5 + $0xa0] sm:$0xf]  ;;  %s2109_s6 = smov [#allocation14]  }
  0x24   :  { %496 = vmatpush.bf16.msra.mxu2 %v1390_v7  ;;  %v1374_v14 = vor.u32 %v1779_v9, %v1371_v10  ;;  %v1777_v16 = vld [vmem:[#allocation5 + $0xac] sm:$0xf0]  ;;  %v1449_v17 = vld [vmem:[#allocation5 + $0x160] sm:$0xf]  ;;  %v1775_v20 = vld [vmem:[#allocation5 + $0xa4] sm:$0xf] }
  0x25   :  { %v399_v18 = vpack.c.b16 %v347_v12, %v347_v12  ;;  %v1801_v19 = vld [vmem:[#allocation5 + $0x16c] sm:$0xf0]  ;;  %v1355_v21 = vld [vmem:[#allocation5 + $0xb0] sm:$0xf0]  ;;  %v400_v22 = vpack.c.b16 %v348_v13, %v348_v13  ;;  %v1354_v24 = vor.u32 %v1777_v16, %v1353_v15  ;;  %v1337_v25 = vld [vmem:[#allocation5 + $0x80] sm:$0xf] }
  0x26   :  { %v1773_v26 = vld [vmem:[#allocation5 + $0x8c] sm:$0xf0]  ;;  %v1450_v28 = vor.u32 %v1801_v19, %v1449_v17  ;;  %v1358_v29 = vor.u32 %v1775_v20, %v1355_v21  ;;  %v1433_v30 = vld [vmem:[#allocation5 + $0x140] sm:$0xf]  ;;  %v1771_v32 = vld [vmem:[#allocation5 + $0x84] sm:$0xf] }
  0x27   :  { %469 = vmatpush.bf16.msra.mxu0 %v1370_v11  ;;  %v457_v23 = vsel %vm455_vm0, %v399_v18, 0  ;;  %v460_v27 = vsel %vm455_vm0, %v400_v22, 0  ;;  %v1797_v31 = vld [vmem:[#allocation5 + $0x14c] sm:$0xf0]  ;;  %v1339_v33 = vld [vmem:[#allocation5 + $0x90] sm:$0xf0]  ;;  %v1338_v37 = vor.u32 %v1773_v26, %v1337_v25 }
  0x28   :  { %485 = vmatpush.bf16.msra.mxu1 %v457_v23  ;;  %497 = vmatpush.bf16.msra.mxu2 %v1374_v14  ;;  %v1799_v34 = vld [vmem:[#allocation5 + $0x164] sm:$0xf]  ;;  %v1451_v35 = vld [vmem:[#allocation5 + $0x170] sm:$0xf0]  ;;  %v1321_v38 = vld [vmem:[#allocation5 + $0x60] sm:$0xf]  ;;  %v1434_v40 = vor.u32 %v1797_v31, %v1433_v30  ;;  %v1342_v41 = vor.u32 %v1771_v32, %v1339_v33 }
  0x29   :  { %513 = vmatpush.bf16.msra.mxu3 %v460_v27  ;;  %v1454_v36 = vor.u32 %v1799_v34, %v1451_v35  ;;  %v1769_v39 = vld [vmem:[#allocation5 + $0x6c] sm:$0xf0]  ;;  %v1417_v42 = vld [vmem:[#allocation5 + $0x120] sm:$0xf]  ;;  %v1795_v43 = vld [vmem:[#allocation5 + $0x144] sm:$0xf] }
  0x2a   :  { %v1435_v44 = vld [vmem:[#allocation5 + $0x150] sm:$0xf0]  ;;  %v1793_v45 = vld [vmem:[#allocation5 + $0x12c] sm:$0xf0]  ;;  %v1767_v46 = vld [vmem:[#allocation5 + $0x64] sm:$0xf]  ;;  %v1322_v50 = vor.u32 %v1769_v39, %v1321_v38 }
  0x2b   :  { %470 = vmatpush.bf16.msra.mxu0 %v1354_v24  ;;  %v1323_v47 = vld [vmem:[#allocation5 + $0x70] sm:$0xf0]  ;;  %v1438_v48 = vor.u32 %v1795_v43, %v1435_v44  ;;  %v1791_v49 = vld [vmem:[#allocation5 + $0x124] sm:$0xf]  ;;  %v1305_v51 = vld [vmem:[#allocation5 + $0x40] sm:$0xf]  ;;  %v1418_v54 = vor.u32 %v1793_v45, %v1417_v42 }
  0x2c   :  { %486 = vmatpush.bf16.msra.mxu1 %v1450_v28  ;;  %498 = vmatpush.bf16.msra.mxu2 %v1358_v29  ;;  %v1765_v52 = vld [vmem:[#allocation5 + $0x4c] sm:$0xf0]  ;;  %v1419_v53 = vld [vmem:[#allocation5 + $0x130] sm:$0xf0]  ;;  %v1326_v55 = vor.u32 %v1767_v46, %v1323_v47  ;;  %v1401_v56 = vld [vmem:[#allocation5 + $0x100] sm:$0xf] }
  0x2d   :  { %514 = vmatpush.bf16.msra.mxu3 %v1454_v36  ;;  %v1789_v57 = vld [vmem:[#allocation5 + $0x10c] sm:$0xf0]  ;;  %v1763_v58 = vld [vmem:[#allocation5 + $0x44] sm:$0xf]  ;;  %v1307_v59 = vld [vmem:[#allocation5 + $0x50] sm:$0xf0]  ;;  %v1422_v62 = vor.u32 %v1791_v49, %v1419_v53  ;;  %v1306_v2 = vor.u32 %v1765_v52, %v1305_v51 }
  0x2e   :  { %v1393_v60 = vld [vmem:[#allocation5 + $0xe8] sm:$0xf]  ;;  %v1786_v61 = vld [vmem:[#allocation5 + $0xf4] sm:$0xf0]  ;;  %v1787_v63 = vld [vmem:[#allocation5 + $0x104] sm:$0xf]  ;;  %v1402_v4 = vor.u32 %v1789_v57, %v1401_v56  ;;  %v1310_v5 = vor.u32 %v1763_v58, %v1307_v59 }
  0x2f   :  { %471 = vmatpush.bf16.msra.mxu0 %v1338_v37  ;;  %v1403_v0 = vld [vmem:[#allocation5 + $0x110] sm:$0xf0]  ;;  %v190_v1 = vld [vmem:[#allocation5 + $0x188] sm:$0x33]  ;;  %v1289_v6 = vld [vmem:[#allocation5 + $0x20] sm:$0xf]  ;;  %v1394_v9 = vor.u32 %v1786_v61, %v1393_v60 }
  0x30   :  { %487 = vmatpush.bf16.msra.mxu1 %v1434_v40  ;;  %499 = vmatpush.bf16.msra.mxu2 %v1342_v41  ;;  %v349_v3 = vunpack.c.l.b16 %v190_v1  ;;  %v1761_v7 = vld [vmem:[#allocation5 + $0x2c] sm:$0xf0]  ;;  %v1759_v8 = vld [vmem:[#allocation5 + $0x24] sm:$0xf]  ;;  %v1291_v10 = vld [vmem:[#allocation5 + $0x30] sm:$0xf0]  ;;  %v1406_v11 = vor.u32 %v1787_v63, %v1403_v0  ;;  %v350_v18 = vunpack.c.h.b16 %v190_v1 }
  0x31   :  { %515 = vmatpush.bf16.msra.mxu3 %v1438_v48  ;;  %v136_v13 = vld [vmem:[#allocation2 + $0x8] sm:$0xff]  ;;  %v138_v14 = vld [vmem:[#allocation2 + $0x18] sm:$0xff]  ;;  %v1273_v17 = vld [vmem:[#allocation5] sm:$0xf]  ;;  %v1290_v19 = vor.u32 %v1761_v7, %v1289_v6  ;;  %v1294_v23 = vor.u32 %v1759_v8, %v1291_v10  ;;  %vm451_vm1 = vcmask 556032   ;;  %s1253_s9 = sshll.u32 %s2109_s6, 4  ;;  %s1254_s9 = int_to_ptr.vmem [resolvable:$true] %s1253_s9 }
  0x32   :  { %v401_v12 = vpack.c.b16 %v349_v3, %v349_v3  ;;  %v1377_v15 = vld [vmem:[#allocation5 + $0xc8] sm:$0xf]  ;;  %v1782_v16 = vld [vmem:[#allocation5 + $0xd4] sm:$0xf0]  ;;  %v1757_v24 = vld [vmem:[#allocation5 + $0xc] sm:$0xf0]  ;;  %v2189_v27 = vpack.c.bf16 %v138_v14, %v136_v13  ;;  %v402_v33 = vpack.c.b16 %v350_v18, %v350_v18 }
  0x33   :  { %472 = vmatpush.bf16.msra.mxu0 %v1322_v50  ;;  %v1457_v21 = vld [vmem:[#allocation5 + $0x168] sm:$0xf]  ;;  %v1802_v22 = vld [vmem:[#allocation5 + $0x174] sm:$0xf0]  ;;  %v1755_v25 = vld [vmem:[#allocation5 + $0x4] sm:$0xf]  ;;  %v1378_v28 = vor.u32 %v1782_v16, %v1377_v15  ;;  %v1274_v35 = vor.u32 %v1757_v24, %v1273_v17 }
  0x34   :  { %488 = vmatpush.bf16.msra.mxu1 %v1418_v54  ;;  %500 = vmatpush.bf16.msra.mxu2 %v1326_v55  ;;  %v463_v20 = vsel %vm455_vm0, %v401_v12, 0  ;;  %v1275_v26 = vld [vmem:[#allocation5 + $0x10] sm:$0xf0]  ;;  %v1784_v29 = vld [vmem:[#allocation5 + $0xec] sm:$0xf]  ;;  %v1458_v34 = vor.u32 %v1802_v22, %v1457_v21  ;;  %v135_v40 = vld [vmem:[#allocation2] sm:$0xff] }
  0x35   :  { %516 = vmatpush.bf16.msra.mxu3 %v1422_v62  ;;  %v1395_v30 = vld [vmem:[#allocation5 + $0xf8] sm:$0xf0]  ;;  %v1361_v31 = vld [vmem:[#allocation5 + $0xa8] sm:$0xf]  ;;  %v1778_v32 = vld [vmem:[#allocation5 + $0xb4] sm:$0xf0]  ;;  %v1278_v38 = vor.u32 %v1755_v25, %v1275_v26 }
  0x36   :  { %v1441_v36 = vld [vmem:[#allocation5 + $0x148] sm:$0xf]  ;;  %v1798_v37 = vld [vmem:[#allocation5 + $0x154] sm:$0xf0]  ;;  %v1398_v39 = vor.u32 %v1784_v29, %v1395_v30  ;;  %v137_v41 = vld [vmem:[#allocation2 + $0x10] sm:$0xff]  ;;  %v1362_v43 = vor.u32 %v1778_v32, %v1361_v31  ;;  %v466_v47 = vsel %vm455_vm0, %v402_v33, 0 }
  0x37   :  { %473 = vmatpush.bf16.msra.mxu0 %v1306_v2  ;;  %v1345_v42 = vld [vmem:[#allocation5 + $0x88] sm:$0xf]  ;;  %v1774_v44 = vld [vmem:[#allocation5 + $0x94] sm:$0xf0]  ;;  %v1780_v45 = vld [vmem:[#allocation5 + $0xcc] sm:$0xf]  ;;  %v1442_v50 = vor.u32 %v1798_v37, %v1441_v36  ;;  %v2196_v51 = vpack.c.bf16 %v137_v41, %v135_v40 }
  0x38   :  { %489 = vmatpush.bf16.msra.mxu1 %v1402_v4  ;;  %501 = vmatpush.bf16.msra.mxu2 %v1310_v5  ;;  %v1379_v46 = vld [vmem:[#allocation5 + $0xd8] sm:$0xf0]  ;;  %v1800_v48 = vld [vmem:[#allocation5 + $0x16c] sm:$0xf]  ;;  %v1425_v52 = vld [vmem:[#allocation5 + $0x128] sm:$0xf]  ;;  %v1346_v55 = vor.u32 %v1774_v44, %v1345_v42 }
  0x39   :  { %517 = vmatpush.bf16.msra.mxu3 %v1406_v11  ;;  %v1459_v49 = vld [vmem:[#allocation5 + $0x178] sm:$0xf0]  ;;  %v1794_v53 = vld [vmem:[#allocation5 + $0x134] sm:$0xf0]  ;;  %v1382_v54 = vor.u32 %v1780_v45, %v1379_v46  ;;  %v1329_v57 = vld [vmem:[#allocation5 + $0x68] sm:$0xf] }
  0x3a   :  { %v1462_v56 = vor.u32 %v1800_v48, %v1459_v49  ;;  %v1776_v58 = vld [vmem:[#allocation5 + $0xac] sm:$0xf]  ;;  %v1363_v59 = vld [vmem:[#allocation5 + $0xb8] sm:$0xf0]  ;;  %v1770_v60 = vld [vmem:[#allocation5 + $0x74] sm:$0xf0]  ;;  %v1426_v63 = vor.u32 %v1794_v53, %v1425_v52 }
  0x3b   :  { %474 = vmatpush.bf16.msra.mxu0 %v1290_v19  ;;  %1463 = vmatmul.msk.bf16.vlgmr.msra.gmra.mxu1 %vm451_vm1, %v2189_v27  ;;  %v1796_v61 = vld [vmem:[#allocation5 + $0x14c] sm:$0xf]  ;;  %v1443_v62 = vld [vmem:[#allocation5 + $0x158] sm:$0xf0]  ;;  %v1409_v0 = vld [vmem:[#allocation5 + $0x108] sm:$0xf]  ;;  %v1366_v2 = vor.u32 %v1776_v58, %v1363_v59  ;;  %v1330_v3 = vor.u32 %v1770_v60, %v1329_v57 }
  0x3c   :  { %524 = vmatpush.bf16.msrb.mxu1 %v1394_v9  ;;  %502 = vmatpush.bf16.msra.mxu2 %v1294_v23  ;;  %v1790_v1 = vld [vmem:[#allocation5 + $0x114] sm:$0xf0]  ;;  %v1446_v4 = vor.u32 %v1796_v61, %v1443_v62  ;;  %v1313_v5 = vld [vmem:[#allocation5 + $0x48] sm:$0xf]  ;;  %v1772_v6 = vld [vmem:[#allocation5 + $0x8c] sm:$0xf] }
  0x3d   :  { %541 = vmatpush.bf16.msrb.mxu3 %v463_v20  ;;  %v1347_v7 = vld [vmem:[#allocation5 + $0x98] sm:$0xf0]  ;;  %v1766_v8 = vld [vmem:[#allocation5 + $0x54] sm:$0xf0]  ;;  %v1792_v9 = vld [vmem:[#allocation5 + $0x12c] sm:$0xf]  ;;  %v1410_v11 = vor.u32 %v1790_v1, %v1409_v0 }
  0x3e   :  { %1464 = vmatmul.msk.bf16.vlgmr.msra.gmra.mxu3 %vm451_vm1, %v2189_v27  ;;  %v1427_v10 = vld [vmem:[#allocation5 + $0x138] sm:$0xf0]  ;;  %v1350_v12 = vor.u32 %v1772_v6, %v1347_v7  ;;  %v1314_v13 = vor.u32 %v1766_v8, %v1313_v5  ;;  %v1297_v15 = vld [vmem:[#allocation5 + $0x28] sm:$0xf]  ;;  %v1768_v16 = vld [vmem:[#allocation5 + $0x6c] sm:$0xf] }
  0x3f   :  { %475 = vmatpush.bf16.msra.mxu0 %v1274_v35  ;;  %v1430_v14 = vor.u32 %v1792_v9, %v1427_v10  ;;  %v1331_v17 = vld [vmem:[#allocation5 + $0x78] sm:$0xf0]  ;;  %v1762_v18 = vld [vmem:[#allocation5 + $0x34] sm:$0xf0]  ;;  %v1788_v19 = vld [vmem:[#allocation5 + $0x10c] sm:$0xf] }
  0x40   :  { %525 = vmatpush.bf16.msrb.mxu1 %v1378_v28  ;;  %503 = vmatpush.bf16.msra.mxu2 %v1278_v38  ;;  %v1411_v20 = vld [vmem:[#allocation5 + $0x118] sm:$0xf0]  ;;  %v1334_v21 = vor.u32 %v1768_v16, %v1331_v17  ;;  %v1298_v22 = vor.u32 %v1762_v18, %v1297_v15  ;;  %v1764_v24 = vld [vmem:[#allocation5 + $0x4c] sm:$0xf]  ;;  %v1281_v26 = vld [vmem:[#allocation5 + $0x8] sm:$0xf] }
  0x41   :  { %542 = vmatpush.bf16.msrb.mxu3 %v1458_v34  ;;  %v1414_v23 = vor.u32 %v1788_v19, %v1411_v20  ;;  %v1315_v25 = vld [vmem:[#allocation5 + $0x58] sm:$0xf0]  ;;  %v1758_v28 = vld [vmem:[#allocation5 + $0x14] sm:$0xf0]  ;;  %v1760_v31 = vld [vmem:[#allocation5 + $0x2c] sm:$0xf] }
  0x42   :  { %476 = vmatmul.bf16.vlgmr.msra.gmra.mxu0 %v2196_v51  ;;  %v1318_v29 = vor.u32 %v1764_v24, %v1315_v25  ;;  %v1282_v30 = vor.u32 %v1758_v28, %v1281_v26  ;;  %v1299_v32 = vld [vmem:[#allocation5 + $0x38] sm:$0xf0]  ;;  %v1756_v34 = vld [vmem:[#allocation5 + $0xc] sm:$0xf]  ;;  %v1581_v37 = vld [vmem:[#allocation7 + $0xe0] sm:$0xf] }
  0x43   :  { %552 = vmatpush.bf16.msrb.mxu0 %v1398_v39  ;;  %504 = vmatmul.bf16.vlgmr.msra.gmra.mxu2 %v2196_v51  ;;  %v1302_v33 = vor.u32 %v1760_v31, %v1299_v32  ;;  %v1283_v35 = vld [vmem:[#allocation5 + $0x18] sm:$0xf0]  ;;  %v1833_v38 = vld [vmem:[#allocation7 + $0xec] sm:$0xf0]  ;;  %v1831_v39 = vld [vmem:[#allocation7 + $0xe4] sm:$0xf] }
  0x44   :  { %526 = vmatpush.bf16.msrb.mxu1 %v1362_v43  ;;  %569 = vmatpush.bf16.msrb.mxu2 %v466_v47  ;;  %v1286_v36 = vor.u32 %v1756_v34, %v1283_v35  ;;  %v1582_v40 = vor.u32 %v1833_v38, %v1581_v37  ;;  %v1583_v41 = vld [vmem:[#allocation7 + $0xf0] sm:$0xf0]  ;;  %v1589_v42 = vld [vmem:[#allocation7 + $0xe8] sm:$0xf]  ;;  %v1834_v43 = vld [vmem:[#allocation7 + $0xf4] sm:$0xf0] }
  0x45   :  { %543 = vmatpush.bf16.msrb.mxu3 %v1442_v50  ;;  %v1590_v44 = vor.u32 %v1834_v43, %v1589_v42  ;;  %v1832_v45 = vld [vmem:[#allocation7 + $0xec] sm:$0xf]  ;;  %v1591_v46 = vld [vmem:[#allocation7 + $0xf8] sm:$0xf0]  ;;  %v1565_v48 = vld [vmem:[#allocation7 + $0xc0] sm:$0xf] }
  0x46   :  { %v1594_v47 = vor.u32 %v1832_v45, %v1591_v46  ;;  %v1829_v49 = vld [vmem:[#allocation7 + $0xcc] sm:$0xf0]  ;;  %v1827_v50 = vld [vmem:[#allocation7 + $0xc4] sm:$0xf]  ;;  %v1567_v52 = vld [vmem:[#allocation7 + $0xd0] sm:$0xf0] }
  0x47   :  { %553 = vmatpush.bf16.msrb.mxu0 %v1382_v54  ;;  %v1573_v53 = vld [vmem:[#allocation7 + $0xc8] sm:$0xf]  ;;  %v1570_v54 = vor.u32 %v1827_v50, %v1567_v52  ;;  %v1575_v57 = vld [vmem:[#allocation7 + $0xd8] sm:$0xf0]  ;;  %v1549_v60 = vld [vmem:[#allocation7 + $0xa0] sm:$0xf] }
  0x48   :  { %527 = vmatpush.bf16.msrb.mxu1 %v1346_v55  ;;  %570 = vmatpush.bf16.msrb.mxu2 %v1462_v56  ;;  %v1830_v55 = vld [vmem:[#allocation7 + $0xd4] sm:$0xf0]  ;;  %v1828_v56 = vld [vmem:[#allocation7 + $0xcc] sm:$0xf]  ;;  %v1825_v61 = vld [vmem:[#allocation7 + $0xac] sm:$0xf0] }
  0x49   :  { %544 = vmatpush.bf16.msrb.mxu3 %v1426_v63  ;;  %v1574_v58 = vor.u32 %v1830_v55, %v1573_v53  ;;  %v1578_v59 = vor.u32 %v1828_v56, %v1575_v57  ;;  %v1823_v62 = vld [vmem:[#allocation7 + $0xa4] sm:$0xf]  ;;  %v1550_v63 = vor.u32 %v1825_v61, %v1549_v60  ;;  %v1551_v0 = vld [vmem:[#allocation7 + $0xb0] sm:$0xf0]  ;;  %v1557_v1 = vld [vmem:[#allocation7 + $0xa8] sm:$0xf] }
  0x4a   :  { %v1824_v5 = vld [vmem:[#allocation7 + $0xac] sm:$0xf]  ;;  %v1559_v6 = vld [vmem:[#allocation7 + $0xb8] sm:$0xf0]  ;;  %v1533_v8 = vld [vmem:[#allocation7 + $0x80] sm:$0xf] }
  0x4b   :  { %554 = vmatpush.bf16.msrb.mxu0 %v1366_v2  ;;  %v1826_v2 = vld [vmem:[#allocation7 + $0xb4] sm:$0xf0]  ;;  %v1562_v7 = vor.u32 %v1824_v5, %v1559_v6  ;;  %v1821_v9 = vld [vmem:[#allocation7 + $0x8c] sm:$0xf0]  ;;  %v1820_v16 = vld [vmem:[#allocation7 + $0x8c] sm:$0xf] }
  0x4c   :  { %528 = vmatpush.bf16.msrb.mxu1 %v1330_v3  ;;  %571 = vmatpush.bf16.msrb.mxu2 %v1446_v4  ;;  %v1554_v3 = vor.u32 %v1823_v62, %v1551_v0  ;;  %v1558_v4 = vor.u32 %v1826_v2, %v1557_v1  ;;  %v1534_v10 = vor.u32 %v1821_v9, %v1533_v8  ;;  %v1822_v15 = vld [vmem:[#allocation7 + $0x94] sm:$0xf0]  ;;  %v1543_v17 = vld [vmem:[#allocation7 + $0x98] sm:$0xf0]  ;;  %v1517_v20 = vld [vmem:[#allocation7 + $0x60] sm:$0xf] }
  0x4d   :  { %545 = vmatpush.bf16.msrb.mxu3 %v1410_v11  ;;  %v1819_v11 = vld [vmem:[#allocation7 + $0x84] sm:$0xf]  ;;  %v1546_v19 = vor.u32 %v1820_v16, %v1543_v17  ;;  %v1519_v25 = vld [vmem:[#allocation7 + $0x70] sm:$0xf0]  ;;  %v1525_v26 = vld [vmem:[#allocation7 + $0x68] sm:$0xf] }
  0x4e   :  { %v1818_v28 = vld [vmem:[#allocation7 + $0x74] sm:$0xf0]  ;;  %v1816_v31 = vld [vmem:[#allocation7 + $0x6c] sm:$0xf]  ;;  %v1527_v32 = vld [vmem:[#allocation7 + $0x78] sm:$0xf0] }
  0x4f   :  { %555 = vmatpush.bf16.msrb.mxu0 %v1350_v12  ;;  %v1535_v12 = vld [vmem:[#allocation7 + $0x90] sm:$0xf0]  ;;  %v1501_v35 = vld [vmem:[#allocation7 + $0x40] sm:$0xf]  ;;  %v1811_v38 = vld [vmem:[#allocation7 + $0x44] sm:$0xf] }
  0x50   :  { %529 = vmatpush.bf16.msrb.mxu1 %v1314_v13  ;;  %572 = vmatpush.bf16.msrb.mxu2 %v1430_v14  ;;  %v1541_v13 = vld [vmem:[#allocation7 + $0x88] sm:$0xf]  ;;  %v1538_v14 = vor.u32 %v1819_v11, %v1535_v12  ;;  %v1814_v42 = vld [vmem:[#allocation7 + $0x54] sm:$0xf0]  ;;  %v1812_v43 = vld [vmem:[#allocation7 + $0x4c] sm:$0xf] }
  0x51   :  { %1465 = vmatmul.msk.bf16.vlgmr.msrb.gmra.mxu3 %vm451_vm1, %v2189_v27  ;;  %v1542_v18 = vor.u32 %v1822_v15, %v1541_v13  ;;  %v1493_v52 = vld [vmem:[#allocation7 + $0x28] sm:$0xf]  ;;  %v1810_v53 = vld [vmem:[#allocation7 + $0x34] sm:$0xf0]  ;;  %v1808_v57 = vld [vmem:[#allocation7 + $0x2c] sm:$0xf] }
  0x52   :  { %798 = vmatpush.bf16.msra.mxu3 %v1582_v40  ;;  %v1509_v40 = vld [vmem:[#allocation7 + $0x48] sm:$0xf]  ;;  %v1494_v56 = vor.u32 %v1810_v53, %v1493_v52  ;;  %v1469_v61 = vld [vmem:[#allocation7] sm:$0xf]  ;;  %v1805_v62 = vld [vmem:[#allocation7 + $0xc] sm:$0xf0] }
  0x53   :  { %556 = vmatpush.bf16.msrb.mxu0 %v1334_v21  ;;  %v1817_v21 = vld [vmem:[#allocation7 + $0x6c] sm:$0xf0]  ;;  %v1803_v0 = vld [vmem:[#allocation7 + $0x4] sm:$0xf]  ;;  %v1471_v1 = vld [vmem:[#allocation7 + $0x10] sm:$0xf0] }
  0x54   :  { %530 = vmatpush.bf16.msrb.mxu1 %v1298_v22  ;;  %573 = vmatpush.bf16.msrb.mxu2 %v1414_v23  ;;  %v1815_v22 = vld [vmem:[#allocation7 + $0x64] sm:$0xf]  ;;  %v1518_v24 = vor.u32 %v1817_v21, %v1517_v20  ;;  %v1477_v2 = vld [vmem:[#allocation7 + $0x8] sm:$0xf]  ;;  %v1806_v5 = vld [vmem:[#allocation7 + $0x14] sm:$0xf0] }
  0x55   :  { %v1804_v6 = vld [vmem:[#allocation7 + $0xc] sm:$0xf]  ;;  %v1478_v8 = vor.u32 %v1806_v5, %v1477_v2  ;;  %v1842_v11 = vld [vmem:[#allocation8 + $0x38] sm:$0xff]  ;;  %v1841_v13 = vld [vmem:[#allocation8 + $0x30] sm:$0xff]  ;;  %s1255_s16 = sshll.u32 %s2225_s7, 4  ;;  %s1256_s16 = int_to_ptr.hbm [resolvable:$true] %s1255_s16 }
  0x56   :  { %v191_v15 = vld [vmem:[#allocation13] ss:$8 sm:$0xf]  ;;  %v1857_v2 = vld [vmem:[#allocation10 + $0x74] sm:$0xf] }
  0x57   :  { %1466 = vmatmul.msk.bf16.vlgmr.msrb.gmra.mxu2 %vm451_vm1, %v2189_v27  ;;  %557 = vmatpush.bf16.msrb.mxu0 %v1318_v29  ;;  %v1586_v27 = vor.u32 %v1831_v39, %v1583_v41  ;;  %v1522_v29 = vor.u32 %v1815_v22, %v1519_v25  ;;  %v1503_v39 = vld [vmem:[#allocation7 + $0x50] sm:$0xf0]  ;;  %v195_v17 = vperm.slane %v191_v15, 2  ;;  %v194_v20 = vperm.slane %v191_v15, 1  ;;  %v1677_v5 = vld [vmem:[#allocation10 + $0x60] sm:$0xf] }
  0x58   :  { %531 = vmatpush.bf16.msrb.mxu1 %v1282_v30  ;;  %826 = vmatpush.bf16.msra.mxu2 %v1590_v44  ;;  %v1526_v30 = vor.u32 %v1818_v28, %v1525_v26  ;;  %v1506_v41 = vor.u32 %v1811_v38, %v1503_v39  ;;  %v1510_v44 = vor.u32 %v1814_v42, %v1509_v40 }
  0x5b   :  { %532 = vmatmul.bf16.vlgmr.msrb.gmra.mxu1 %v2196_v51  ;;  %558 = vmatpush.bf16.msrb.mxu0 %v1302_v33  ;;  %v1530_v33 = vor.u32 %v1816_v31, %v1527_v32 }
  0x5c   :  { %812 = vmatpush.bf16.msra.mxu1 %v1586_v27  ;;  %827 = vmatpush.bf16.msra.mxu2 %v1574_v58  ;;  %v1511_v27 = vld [vmem:[#allocation7 + $0x58] sm:$0xf0] }
  0x5d   :  { %v1514_v45 = vor.u32 %v1812_v43, %v1511_v27  ;;  %v1495_v58 = vld [vmem:[#allocation7 + $0x38] sm:$0xf0] }
  0x5e   :  { %v1498_v60 = vor.u32 %v1808_v57, %v1495_v58  ;;  %v1840_v58 = vld [vmem:[#allocation8 + $0x28] sm:$0xff] }
  0x5f   :  { %559 = vmatpush.bf16.msrb.mxu0 %v1286_v36  ;;  %v1813_v36 = vld [vmem:[#allocation7 + $0x4c] sm:$0xf0] }
  0x60   :  { %813 = vmatpush.bf16.msra.mxu1 %v1570_v54  ;;  %828 = vmatpush.bf16.msra.mxu2 %v1558_v4  ;;  %v1502_v37 = vor.u32 %v1813_v36, %v1501_v35  ;;  %v1474_v4 = vor.u32 %v1803_v0, %v1471_v1  ;;  %v1685_v0 = vld [vmem:[#allocation10 + $0x70] sm:$0xf]  ;;  %v1858_v1 = vld [vmem:[#allocation10 + $0x74] sm:$0xf0] }
  0x62   :  { %560 = vmatmul.bf16.vlgmr.msrb.gmra.mxu0 %v2196_v51  ;;  %v1566_v51 = vor.u32 %v1829_v49, %v1565_v48  ;;  %v1809_v48 = vld [vmem:[#allocation7 + $0x2c] sm:$0xf0]  ;;  %v1807_v49 = vld [vmem:[#allocation7 + $0x24] sm:$0xf] }
  0x63   :  { %840 = vmatpush.bf16.msra.mxu0 %v1594_v47  ;;  %v1485_v47 = vld [vmem:[#allocation7 + $0x20] sm:$0xf] }
  0x64   :  { %799 = vmatpush.bf16.msra.mxu3 %v1566_v51  ;;  %814 = vmatpush.bf16.msra.mxu1 %v1554_v3  ;;  %v1486_v50 = vor.u32 %v1809_v48, %v1485_v47  ;;  %v1487_v51 = vld [vmem:[#allocation7 + $0x30] sm:$0xf0] }
  0x65   :  { %829 = vmatpush.bf16.msra.mxu2 %v1542_v18  ;;  %v1490_v55 = vor.u32 %v1807_v49, %v1487_v51  ;;  %v196_v18 = vperm.slane %v191_v15, 3 }
  0x67   :  { %841 = vmatpush.bf16.msra.mxu0 %v1578_v59 }
  0x68   :  { %800 = vmatpush.bf16.msra.mxu3 %v1550_v63  ;;  %815 = vmatpush.bf16.msra.mxu1 %v1538_v14  ;;  %v1470_v63 = vor.u32 %v1805_v62, %v1469_v61  ;;  %v1837_v61 = vld [vmem:[#allocation8 + $0x10] sm:$0xff]  ;;  %v1836_v62 = vld [vmem:[#allocation8 + $0x8] sm:$0xff] }
  0x69   :  { %830 = vmatpush.bf16.msra.mxu2 %v1526_v30 }
  0x6b   :  { %842 = vmatpush.bf16.msra.mxu0 %v1562_v7  ;;  %v1479_v7 = vld [vmem:[#allocation7 + $0x18] sm:$0xf0] }
  0x6c   :  { %801 = vmatpush.bf16.msra.mxu3 %v1534_v10  ;;  %816 = vmatpush.bf16.msra.mxu1 %v1522_v29  ;;  %v1482_v9 = vor.u32 %v1804_v6, %v1479_v7  ;;  %v1856_v6 = vld [vmem:[#allocation10 + $0x64] sm:$0xf0] }
  0x6d   :  { %831 = vmatpush.bf16.msra.mxu2 %v1510_v44 }
  0x6f   :  { %843 = vmatpush.bf16.msra.mxu0 %v1546_v19  ;;  %v193_v19 = vperm.slane %v191_v15, 0  ;;  %v1671_v15 = vld [vmem:[#allocation10 + $0x58] sm:$0xf0] }
  0x70   :  { %802 = vmatpush.bf16.msra.mxu3 %v1518_v24  ;;  %817 = vmatpush.bf16.msra.mxu1 %v1506_v41 }
  0x71   :  { %832 = vmatpush.bf16.msra.mxu2 %v1494_v56 }
  0x73   :  { %844 = vmatpush.bf16.msra.mxu0 %v1530_v33 }
  0x74   :  { %803 = vmatpush.bf16.msra.mxu3 %v1502_v37  ;;  %818 = vmatpush.bf16.msra.mxu1 %v1490_v55 }
  0x75   :  { %833 = vmatpush.bf16.msra.mxu2 %v1478_v8  ;;  %v1855_v8 = vld [vmem:[#allocation10 + $0x64] sm:$0xf] }
  0x77   :  { %845 = vmatpush.bf16.msra.mxu0 %v1514_v45 }
  0x78   :  { %804 = vmatpush.bf16.msra.mxu3 %v1486_v50  ;;  %819 = vmatpush.bf16.msra.mxu1 %v1474_v4  ;;  %v1687_v4 = vld [vmem:[#allocation10 + $0x78] sm:$0xf0] }
  0x79   :  { %v1690_v7 = vor.u32 %v1857_v2, %v1687_v4  ;;  %v1645_v2 = vld [vmem:[#allocation10 + $0x20] sm:$0xf]  ;;  %v1847_v4 = vld [vmem:[#allocation10 + $0x24] sm:$0xf] }
  0x7b   :  { %846 = vmatpush.bf16.msra.mxu0 %v1498_v60  ;;  %v1838_v60 = vld [vmem:[#allocation8 + $0x18] sm:$0xff]  ;;  %1068 = vmatpush.bf16.msrb.mxu2 %v1690_v7 }
  0x7c   :  { %805 = vmatpush.bf16.msra.mxu3 %v1470_v63  ;;  %v1835_v63 = vld [vmem:[#allocation8] sm:$0xff] }
  0x7f   :  { %847 = vmatpush.bf16.msra.mxu0 %v1482_v9  ;;  %v1679_v9 = vld [vmem:[#allocation10 + $0x68] sm:$0xf0] }
  0x80   :  { %934 = vmatpush.bf16.msrb.mxu3 %v1842_v11  ;;  %v1682_v11 = vor.u32 %v1855_v8, %v1679_v9  ;;  %v1637_v8 = vld [vmem:[#allocation10 + $0x10] sm:$0xf]  ;;  %v1846_v9 = vld [vmem:[#allocation10 + $0x14] sm:$0xf0] }
  0x82   :  { %1069 = vmatpush.bf16.msrb.mxu2 %v1682_v11  ;;  %v1638_v11 = vor.u32 %v1846_v9, %v1637_v8 }
  0x84   :  { %935 = vmatpush.bf16.msrb.mxu3 %v1841_v13  ;;  %v1854_v13 = vld [vmem:[#allocation10 + $0x54] sm:$0xf0] }
  0x88   :  { %936 = vmatpush.bf16.msrb.mxu3 %v1840_v58 }
  0xb8   :  { %v2206_v23 = vpop.f32.mrf.mxu1 }
  0xbf   :  { %v477_v54 = vpop.f32.mrf.mxu0 }
  0xc0   :  { %v493_v59 = vpop.f32.mrf.mxu1  ;;  %v478_v28 = vadd.f32 %v477_v54, %v193_v19 }
  0xc1   :  { %v2208_v34 = vpop.f32.mrf.mxu3 }
  0xc2   :  { %v492_v37 = vadd.f32 %v2206_v23, %v478_v28 }
  0xc4   :  { %v580_v47 = vmax.f32 %v492_v37, 0.0 }
  0xc6   :  { %v505_v46 = vpop.f32.mrf.mxu2 }
  0xc7   :  { %v479_v12 = vpop.f32.mrf.mxu0  ;;  %v506_v29 = vadd.f32 %v505_v46, %v194_v20 }
  0xc8   :  { %v480_v31 = vadd.f32 %v479_v12, %v193_v19  ;;  %v1669_v12 = vld [vmem:[#allocation10 + $0x50] sm:$0xf] }
  0xc9   :  { %v521_v3 = vpop.f32.mrf.mxu3  ;;  %v520_v38 = vadd.f32 %v2208_v34, %v506_v29 }
  0xca   :  { %v494_v40 = vadd.f32 %v493_v59, %v480_v31  ;;  %v1839_v59 = vld [vmem:[#allocation8 + $0x20] sm:$0xff] }
  0xcb   :  { %v581_v46 = vmax.f32 %v520_v38, 0.0  ;;  %937 = vmatpush.bf16.msrb.mxu3 %v1839_v59 }
  0xcc   :  { %v584_v50 = vmax.f32 %v494_v40, 0.0 }
  0xcd   :  { %v588_v54 = vmax.f32 %v580_v47, %v581_v46 }
  0xce   :  { %v507_v10 = vpop.f32.mrf.mxu2 }
  0xcf   :  { %v508_v30 = vadd.f32 %v507_v10, %v194_v20  ;;  %938 = vmatpush.bf16.msrb.mxu3 %v1838_v60  ;;  %v1678_v10 = vor.u32 %v1856_v6, %v1677_v5  ;;  %v1661_v20 = vld [vmem:[#allocation10 + $0x40] sm:$0xf]  ;;  %v1653_v60 = vld [vmem:[#allocation10 + $0x30] sm:$0xf]  ;;  %v1647_v6 = vld [vmem:[#allocation10 + $0x28] sm:$0xf0] }
  0xd0   :  { %v1650_v7 = vor.u32 %v1847_v4, %v1647_v6 }
  0xd1   :  { %v522_v39 = vadd.f32 %v521_v3, %v508_v30  ;;  %v1686_v3 = vor.u32 %v1858_v1, %v1685_v0  ;;  %v1655_v0 = vld [vmem:[#allocation10 + $0x38] sm:$0xf0] }
  0xd3   :  { %v585_v48 = vmax.f32 %v522_v39, 0.0  ;;  %939 = vmatpush.bf16.msrb.mxu3 %v1837_v61  ;;  %1054 = vmatpush.bf16.msrb.mxu1 %v1686_v3  ;;  %v1850_v61 = vld [vmem:[#allocation10 + $0x34] sm:$0xf0]  ;;  %v1848_v3 = vld [vmem:[#allocation10 + $0x24] sm:$0xf0] }
  0xd4   :  { %v547_v16 = vpop.f32.mrf.mxu3  ;;  %v1646_v5 = vor.u32 %v1848_v3, %v1645_v2 }
  0xd5   :  { %v589_v23 = vmax.f32 %v584_v50, %v585_v48 }
  0xd7   :  { %940 = vmatpush.bf16.msrb.mxu3 %v1836_v62  ;;  %1055 = vmatpush.bf16.msrb.mxu1 %v1678_v10  ;;  %v1849_v62 = vld [vmem:[#allocation10 + $0x34] sm:$0xf] }
  0xd8   :  { %v533_v14 = vpop.f32.mrf.mxu1  ;;  %v1658_v1 = vor.u32 %v1849_v62, %v1655_v0  ;;  %v1845_v10 = vld [vmem:[#allocation10 + $0x14] sm:$0xf] }
  0xd9   :  { %v534_v24 = vadd.f32 %v533_v14, %v195_v17  ;;  %v1853_v14 = vld [vmem:[#allocation10 + $0x54] sm:$0xf] }
  0xda   :  { %v575_v21 = vpop.f32.mrf.mxu2  ;;  %v1674_v19 = vor.u32 %v1853_v14, %v1671_v15  ;;  %v1629_v14 = vld [vmem:[#allocation10] sm:$0xf]  ;;  %v1844_v15 = vld [vmem:[#allocation10 + $0x4] sm:$0xf0] }
  0xdb   :  { %v548_v32 = vadd.f32 %v547_v16, %v534_v24  ;;  %941 = vmatpush.bf16.msrb.mxu3 %v1835_v63  ;;  %v1663_v24 = vld [vmem:[#allocation10 + $0x48] sm:$0xf0]  ;;  %v1654_v63 = vor.u32 %v1850_v61, %v1653_v60 }
  0xdc   :  { %v549_v36 = vpop.f32.mrf.mxu3  ;;  %1070 = vmatpush.bf16.msrb.mxu2 %v1674_v19 }
  0xdd   :  { %v582_v42 = vmax.f32 %v548_v32, 0.0 }
  0xdf   :  { %v561_v22 = vpop.f32.mrf.mxu0 }
  0xe0   :  { %v562_v25 = vadd.f32 %v561_v22, %v196_v18  ;;  %v535_v26 = vpop.f32.mrf.mxu1  ;;  %v1851_v22 = vld [vmem:[#allocation10 + $0x44] sm:$0xf] }
  0xe1   :  { %v536_v33 = vadd.f32 %v535_v26, %v195_v17  ;;  %v1666_v31 = vor.u32 %v1851_v22, %v1663_v24  ;;  %v1865_v22 = vld [vmem:[#allocation11 + $0x30] sm:$0xff] }
  0xe2   :  { %v576_v35 = vadd.f32 %v575_v21, %v562_v25  ;;  %v577_v45 = vpop.f32.mrf.mxu2  ;;  %v1852_v21 = vld [vmem:[#allocation10 + $0x44] sm:$0xf0]  ;;  %v1873_v24 = vld [vmem:[#allocation11 + $0x70] sm:$0xff] }
  0xe3   :  { %v550_v27 = vadd.f32 %v549_v36, %v536_v33  ;;  %v628_v25 = vld [vmem:[#allocation13 + $0x1] ss:$8 sm:$0xf]  ;;  %v1662_v26 = vor.u32 %v1852_v21, %v1661_v20  ;;  %1071 = vmatpush.bf16.msrb.mxu2 %v1666_v31 }
  0xe4   :  { %v583_v43 = vmax.f32 %v576_v35, 0.0  ;;  %v630_v28 = vperm.slane %v628_v25, 0  ;;  %v632_v30 = vperm.slane %v628_v25, 2  ;;  %v631_v33 = vperm.slane %v628_v25, 1  ;;  %v1866_v20 = vld [vmem:[#allocation11 + $0x38] sm:$0xff] }
  0xe5   :  { %v586_v52 = vmax.f32 %v550_v27, 0.0  ;;  %v633_v35 = vperm.slane %v628_v25, 3  ;;  %v1874_v21 = vld [vmem:[#allocation11 + $0x78] sm:$0xff]  ;;  %1217 = vmatpush.bf16.msrb.mxu0 %v1866_v20  ;;  %v1864_v25 = vld [vmem:[#allocation11 + $0x28] sm:$0xff] }
  0xe6   :  { %v590_v51 = vmax.f32 %v582_v42, %v583_v43 }
  0xe7   :  { %v563_v41 = vpop.f32.mrf.mxu0  ;;  %1072 = vmatpush.bf16.msrb.mxu2 %v1658_v1 }
  0xe8   :  { %v564_v44 = vadd.f32 %v563_v41, %v196_v18  ;;  %v592_v34 = vmax.f32 %v588_v54, %v590_v51  ;;  %v1670_v18 = vor.u32 %v1854_v13, %v1669_v12  ;;  %v1639_v12 = vld [vmem:[#allocation10 + $0x18] sm:$0xf0] }
  0xe9   :  { %v1642_v13 = vor.u32 %v1845_v10, %v1639_v12  ;;  %1218 = vmatpush.bf16.msrb.mxu0 %v1865_v22 }
  0xea   :  { %v578_v49 = vadd.f32 %v577_v45, %v564_v44  ;;  %1056 = vmatpush.bf16.msrb.mxu1 %v1670_v18  ;;  %v1631_v18 = vld [vmem:[#allocation10 + $0x8] sm:$0xf0] }
  0xeb   :  { %1073 = vmatpush.bf16.msrb.mxu2 %v1650_v7 }
  0xec   :  { %v587_v53 = vmax.f32 %v578_v49, 0.0 }
  0xed   :  { %1219 = vmatpush.bf16.msrb.mxu0 %v1864_v25 }
  0xee   :  { %v591_v55 = vmax.f32 %v586_v52, %v587_v53  ;;  %1057 = vmatpush.bf16.msrb.mxu1 %v1662_v26  ;;  %v1872_v26 = vld [vmem:[#allocation11 + $0x68] sm:$0xff] }
  0xef   :  { %1074 = vmatpush.bf16.msrb.mxu2 %v1642_v13 }
  0xf0   :  { %v593_v56 = vmax.f32 %v589_v23, %v591_v55 }
  0xf2   :  { %v594_v57 = vpack.c.bf16 %v593_v56, %v592_v34  ;;  %1058 = vmatpush.bf16.msrb.mxu1 %v1654_v63  ;;  %v1120_v63 = vld [vmem:[#allocation13 + $0x4] ss:$0 sm:$0xff] }
  0xf4   :  { %806 = vmatmul.bf16.vlgmr.msra.gmra.mxu3 %v594_v57  ;;  %820 = vmatmul.bf16.vlgmr.msra.gmra.mxu1 %v594_v57 }
  0xf5   :  { %834 = vmatmul.bf16.vlgmr.msra.gmra.mxu2 %v594_v57  ;;  %848 = vmatmul.bf16.vlgmr.msra.gmra.mxu0 %v594_v57 }
  0xf6   :  { %1059 = vmatpush.bf16.msrb.mxu1 %v1646_v5  ;;  %1231 = vmatpush.bf16.msra.mxu3 %v1874_v21 }
  0xfa   :  { %1060 = vmatpush.bf16.msrb.mxu1 %v1638_v11  ;;  %1232 = vmatpush.bf16.msra.mxu3 %v1873_v24 }
  0xfe   :  { %1233 = vmatpush.bf16.msra.mxu3 %v1872_v26 }
 0x171   :  { %v821_v16 = vpop.f32.mrf.mxu1 }
 0x172   :  { %v849_v17 = vpop.f32.mrf.mxu0  ;;  %v822_v40 = vadd.f32 %v821_v16, %v631_v33  ;;  %v1843_v16 = vld [vmem:[#allocation10 + $0x4] sm:$0xf] }
 0x173   :  { %v850_v41 = vadd.f32 %v849_v17, %v633_v35  ;;  %v1630_v17 = vor.u32 %v1844_v15, %v1629_v14  ;;  %v1634_v19 = vor.u32 %v1843_v16, %v1631_v18 }
 0x174   :  { %v855_v48 = vmax.f32 %v822_v40, 0.0  ;;  %v1861_v40 = vld [vmem:[#allocation11 + $0x10] sm:$0xff] }
 0x175   :  { %v857_v49 = vmax.f32 %v850_v41, 0.0  ;;  %1061 = vmatpush.bf16.msrb.mxu1 %v1630_v17  ;;  %1075 = vmatpush.bf16.msrb.mxu2 %v1634_v19  ;;  %v1870_v41 = vld [vmem:[#allocation11 + $0x58] sm:$0xff] }
 0x177   :  { %v807_v29 = vpop.f32.mrf.mxu3 }
 0x178   :  { %v835_v32 = vpop.f32.mrf.mxu2  ;;  %v808_v36 = vadd.f32 %v807_v29, %v630_v28 }
 0x179   :  { %v836_v37 = vadd.f32 %v835_v32, %v632_v30  ;;  %v823_v38 = vpop.f32.mrf.mxu1 }
 0x17a   :  { %v851_v39 = vpop.f32.mrf.mxu0  ;;  %v824_v42 = vadd.f32 %v823_v38, %v631_v33  ;;  %v854_v43 = vmax.f32 %v808_v36, 0.0  ;;  %v1862_v38 = vld [vmem:[#allocation11 + $0x18] sm:$0xff] }
 0x17b   :  { %v856_v27 = vmax.f32 %v836_v37, 0.0  ;;  %v852_v44 = vadd.f32 %v851_v39, %v633_v35  ;;  %v1871_v39 = vld [vmem:[#allocation11 + $0x60] sm:$0xff] }
 0x17c   :  { %v859_v51 = vmax.f32 %v824_v42, 0.0  ;;  %v862_v53 = vmax.f32 %v854_v43, %v855_v48  ;;  %1234 = vmatpush.bf16.msra.mxu3 %v1871_v39  ;;  %v1860_v42 = vld [vmem:[#allocation11 + $0x8] sm:$0xff]  ;;  %v1869_v43 = vld [vmem:[#allocation11 + $0x50] sm:$0xff] }
 0x17d   :  { %v864_v54 = vmax.f32 %v856_v27, %v857_v49  ;;  %v861_v23 = vmax.f32 %v852_v44, 0.0  ;;  %v1859_v27 = vld [vmem:[#allocation11] sm:$0xff]  ;;  %v1868_v44 = vld [vmem:[#allocation11 + $0x48] sm:$0xff] }
 0x17f   :  { %v809_v45 = vpop.f32.mrf.mxu3  ;;  %v866_v57 = vmax.f32 %v862_v53, %v864_v54 }
 0x180   :  { %v810_v47 = vadd.f32 %v809_v45, %v630_v28  ;;  %v837_v46 = vpop.f32.mrf.mxu2  ;;  %v1863_v28 = vld [vmem:[#allocation11 + $0x20] sm:$0xff]  ;;  %1235 = vmatpush.bf16.msra.mxu3 %v1870_v41 }
 0x181   :  { %v838_v50 = vadd.f32 %v837_v46, %v632_v30  ;;  %1220 = vmatpush.bf16.msrb.mxu0 %v1863_v28  ;;  %v885_v30 = vld [vmem:[#allocation13 + $0x2] ss:$0 sm:$0xff] }
 0x182   :  { %v858_v52 = vmax.f32 %v810_v47, 0.0  ;;  %v1867_v45 = vld [vmem:[#allocation11 + $0x40] sm:$0xff] }
 0x183   :  { %v860_v55 = vmax.f32 %v838_v50, 0.0  ;;  %v968_v47 = vld [vmem:[#allocation13 + $0x3] ss:$8 sm:$0x3] }
 0x184   :  { %v863_v34 = vmax.f32 %v858_v52, %v859_v51  ;;  %1236 = vmatpush.bf16.msra.mxu3 %v1869_v43  ;;  %v970_v48 = vperm.slane %v968_v47, 0  ;;  %v971_v52 = vperm.slane %v968_v47, 1 }
 0x185   :  { %v865_v56 = vmax.f32 %v860_v55, %v861_v23  ;;  %1221 = vmatpush.bf16.msrb.mxu0 %v1862_v38 }
 0x187   :  { %v867_v58 = vmax.f32 %v863_v34, %v865_v56 }
 0x188   :  { %1237 = vmatpush.bf16.msra.mxu3 %v1868_v44 }
 0x189   :  { %v868_v59 = vpack.c.bf16 %v867_v58, %v866_v57  ;;  %1222 = vmatpush.bf16.msrb.mxu0 %v1861_v40 }
 0x18b   :  { %942 = vmatmul.bf16.vlgmr.msrb.gmra.mxu3 %v868_v59 }
 0x18c   :  { %1238 = vmatpush.bf16.msra.mxu3 %v1867_v45 }
 0x18d   :  { %1223 = vmatpush.bf16.msrb.mxu0 %v1860_v42 }
 0x191   :  { %1224 = vmatpush.bf16.msrb.mxu0 %v1859_v27 }
 0x20e   :  { %v943_v29 = vpop.f32.mrf.mxu3 }
 0x20f   :  { %v944_v31 = vadd.f32 %v943_v29, %v885_v30 }
 0x211   :  { %v948_v35 = vmax.f32 %v944_v31, 0.0 }
 0x216   :  { %v945_v32 = vpop.f32.mrf.mxu3 }
 0x217   :  { %v946_v33 = vadd.f32 %v945_v32, %v885_v30 }
 0x219   :  { %v949_v36 = vmax.f32 %v946_v33, 0.0 }
 0x21b   :  { %v950_v37 = vpack.c.bf16 %v949_v36, %v948_v35 }
 0x21d   :  { %1062 = vmatmul.bf16.vlgmr.msrb.gmra.mxu1 %v950_v37  ;;  %1076 = vmatmul.bf16.vlgmr.msrb.gmra.mxu2 %v950_v37 }
 0x29a   :  { %v1063_v46 = vpop.f32.mrf.mxu1 }
 0x29b   :  { %v1064_v50 = vadd.f32 %v1063_v46, %v970_v48 }
 0x29d   :  { %v1082_v54 = vmax.f32 %v1064_v50, 0.0 }
 0x2a0   :  { %v1077_v49 = vpop.f32.mrf.mxu2 }
 0x2a1   :  { %v1078_v55 = vadd.f32 %v1077_v49, %v971_v52 }
 0x2a2   :  { %v1065_v51 = vpop.f32.mrf.mxu1 }
 0x2a3   :  { %v1066_v53 = vadd.f32 %v1065_v51, %v970_v48  ;;  %v1083_v58 = vmax.f32 %v1078_v55, 0.0 }
 0x2a5   :  { %v1084_v23 = vmax.f32 %v1066_v53, 0.0 }
 0x2a7   :  { %v1086_v34 = vpack.c.bf16 %v1084_v23, %v1082_v54 }
 0x2a8   :  { %v1079_v56 = vpop.f32.mrf.mxu2 }
 0x2a9   :  { %v1080_v57 = vadd.f32 %v1079_v56, %v971_v52  ;;  %1225 = vmatmul.bf16.vlgmr.msrb.gmra.mxu0 %v1086_v34 }
 0x2ab   :  { %v1085_v59 = vmax.f32 %v1080_v57, 0.0 }
 0x2ad   :  { %v1087_v60 = vpack.c.bf16 %v1085_v59, %v1083_v58 }
 0x2af   :  { %1239 = vmatmul.bf16.vlgmr.msra.gmra.mxu3 %v1087_v60 }
 0x326   :  { %v1226_v61 = vpop.f32.mrf.mxu0 }
 0x327   :  { %v1227_v1 = vadd.f32 %v1226_v61, %v1120_v63 }
 0x32e   :  { %v1228_v0 = vpop.f32.mrf.mxu0 }
 0x32f   :  { %v1229_v2 = vadd.f32 %v1228_v0, %v1120_v63 }
 0x332   :  { %v1240_v62 = vpop.f32.mrf.mxu3 }
 0x333   :  { %v1241_v4 = vadd.f32 %v1240_v62, %v1227_v1 }
 0x33a   :  { %v1242_v3 = vpop.f32.mrf.mxu3 }
 0x33b   :  { %v1243_v5 = vadd.f32 %v1242_v3, %v1229_v2 }
 0x33d   :  { %v1878_v6 = vpack.c.bf16 %v1243_v5, %v1241_v4 }
 0x33f   :  { %1879 = vst [vmem:[#allocation14] sm:$0xff] %v1878_v6  }
 0x340   :  { %1261 = dma.vmem_to_hbm [thread:$0]  %s1254_s9, 128, %s1256_s16, [#allocation4], %s2100_s13, %s2100_s13, %s2101_s1  }
 0x341   :  { %2094 = dma.done.wait [#allocation4], 128  }
 0x342   :  { %2095 = vsyncadd [#allocation4], 4294967168 }
 0x343   :  { %1266 = vsyncpa [#allocation3], 1 }
 0x344   :  { %1267 = vsyncpa [#allocation6], 1 }
 0x345   :  { %1268 = vsyncpa [#allocation9], 1 }
 0x346   :  { %1269 = vsyncpa [#allocation12], 1 }
 0x347   :  { %1270 = vsyncpa [#allocation4], 1 }

</bundles_post_ra>
